<compile_context>
chip_gen: v7x
topology: tpu7x:2x2x1
jax: 0.10.0
libtpu: 0.0.40
codegen_flags: <defaults>
</compile_context>

<pallas_src>
import functools
import math

import jax
import jax.numpy as jnp
from jax import lax
from jax.experimental import pallas as pl
from jax.experimental.pallas import tpu as pltpu

LN2 = 0.69314718056  # constant used by the PyTorch reference (= ln 2 to ~1e-12)


# ---------------------------------------------------------------------------
# Trace-time hardware queries & tiling helpers
# ---------------------------------------------------------------------------
def _cdiv(a, b):
    return -(-a // b)


def _round_up(x, m):
    return _cdiv(x, m) * m


def _sublane(dtype):
    # second-minor tile granularity: 8 for f32, 16 for bf16, 32 for int8/fp8
    return max(8, 32 // jnp.dtype(dtype).itemsize)


def _device_kind():
    try:
        return jax.local_devices()[0].device_kind.lower()
    except Exception:
        return ""


def _num_tensorcores():
    """TensorCores per JAX device: 2 on v7x (and v4/v5p megacore), else 1."""
    kind = _device_kind()
    if "v7" in kind or "v4" in kind or "v5p" in kind:
        return 2
    return 1


def _vmem_limit_bytes():
    """Scoped VMEM limit, derived per device kind at trace time."""
    phys = None
    try:
        info = pltpu.get_tpu_info()
        for attr in ("vmem_capacity_bytes", "vmem_size_bytes", "vmem_bytes"):
            v = getattr(info, attr, None)
            if v:
                phys = int(v)
                break
    except Exception:
        phys = None
    if phys is None:
        # v7x has 64 MiB/TC; v5e/v6e have 128 MiB.
        phys = 64 * 1024 * 1024 if "v7" in _device_kind() else 128 * 1024 * 1024
    return min(int(0.75 * phys), 96 * 1024 * 1024)


def _budget_elems(in_dtype, out_dtype, vmem_limit):
    """Max elements per block from the actual per-element VMEM footprint:
    2 pipeline buffers each for input & output (HBM-side dtype) plus ~2 live
    f32 temporaries inside the kernel body, with headroom for Mosaic scratch."""
    in_b = jnp.dtype(in_dtype).itemsize
    out_b = jnp.dtype(out_dtype).itemsize
    per_elem = 2 * in_b + 2 * out_b + 8
    return max(8 * 128, int(vmem_limit * 0.7) // per_elem)


def _pick_tile(total, max_tile, align, ncores):
    """Tile size along one axis: either the full extent, or a multiple of
    `align` (the (8,128) rule).  On 2-TC chips prefer a balanced, even number
    of grid steps so both TensorCores get work; on 1-TC chips never split a
    problem that already fits (the grid is a sequential loop there)."""
    total = int(total)
    align = max(int(align), 1)
    max_tile = max(int(max_tile), 1)
    if total <= align:
        return total
    cap = max(align, (min(max_tile, total) // align) * align)
    if ncores < 2:
        return total if total <= max_tile else cap
    for steps in range(2, _cdiv(total, align) + 2, 2):
        t = _round_up(_cdiv(total, steps), align)
        if t > cap:
            continue
        if _cdiv(total, t) % 2 == 0:
            return t
    return cap


# ---------------------------------------------------------------------------
# Kernels
# ---------------------------------------------------------------------------
def _softmax_lane_kernel(x_ref, o_ref):
    # Block (TR, D); base-2 softmax along the lane (last) axis.  Padded edge
    # rows hold garbage but are row-independent and masked on store.
    x = x_ref[...].astype(jnp.float32)
    m = jnp.max(x, axis=-1, keepdims=True)
    e = jnp.exp2(x - m)                       # exp((x-m)*ln2) == 2**(x-m)
    s = jnp.sum(e, axis=-1, keepdims=True)
    inv = pl.reciprocal(s, approx=True)       # EUP slot
    inv = inv * (2.0 - s * inv)               # one Newton step -> f32 accuracy
    o_ref[...] = (e * inv).astype(o_ref.dtype)


def _softmax_packed_lane_kernel(x_ref, o_ref, *, d, pack):
    # Block (TR, pack*d) with pack*d == 128: `pack` logical rows share one
    # 128-wide lane tile -> lane-dense loads/stores even for small d.
    # Segmented max/sum over contiguous d-long lane segments via an iota mask
    # (d is always a power of two here, so // d lowers to a shift).
    x = x_ref[...].astype(jnp.float32)
    seg = lax.broadcasted_iota(jnp.int32, x.shape, x.ndim - 1) // d
    neg_inf = jnp.float32(-jnp.inf)
    m = jnp.zeros_like(x)
    for k in range(pack):                     # static unroll; pack <= 16
        in_seg = seg == k
        mk = jnp.max(jnp.where(in_seg, x, neg_inf), axis=-1, keepdims=True)
        m = jnp.where(in_seg, mk, m)
    e = jnp.exp2(x - m)
    s = jnp.zeros_like(x)
    for k in range(pack):
        in_seg = seg == k
        sk = jnp.sum(jnp.where(in_seg, e, 0.0), axis=-1, keepdims=True)
        s = jnp.where(in_seg, sk, s)
    inv = pl.reciprocal(s, approx=True)
    inv = inv * (2.0 - s * inv)
    o_ref[...] = (e * inv).astype(o_ref.dtype)


def _softmax_sublane_kernel(x_ref, o_ref):
    # Block (TP, D, TQ); base-2 softmax along the middle (sublane) axis.
    # The lane (trailing) axis stays dense -> unmasked vector stores and no
    # HBM transpose.  Padded pre/post edge positions hold garbage but the
    # reduction never spans a padded axis and Pallas masks OOB stores.
    x = x_ref[...].astype(jnp.float32)
    m = jnp.max(x, axis=1, keepdims=True)
    e = jnp.exp2(x - m)
    s = jnp.sum(e, axis=1, keepdims=True)
    inv = pl.reciprocal(s, approx=True)
    inv = inv * (2.0 - s * inv)
    o_ref[...] = (e * inv).astype(o_ref.dtype)


def _softmax_stats_kernel(x_ref, m_ref, l_ref, *, d, tile_d):
    # Pass 1 of the online softmax: stream (TR, tile_d) chunks of the reduction
    # axis (grid axis 1, "arbitrary") accumulating the running max m and the
    # rescaled sum l directly in the resident output blocks.
    k = pl.program_id(1)

    @pl.when(k == 0)
    def _():
        m_ref[...] = jnp.full(m_ref.shape, -jnp.inf, m_ref.dtype)
        l_ref[...] = jnp.zeros(l_ref.shape, l_ref.dtype)

    x = x_ref[...].astype(jnp.float32)
    if d % tile_d != 0:
        # Mask the padded tail lanes of the final chunk so they cannot pollute
        # the row max / sum (exp2(-inf - m) == 0).
        lane = lax.broadcasted_iota(jnp.int32, x.shape, 1) + k * tile_d
        x = jnp.where(lane < d, x, -jnp.inf)
    m_prev = m_ref[...]
    m_new = jnp.maximum(m_prev, jnp.max(x, axis=-1, keepdims=True))
    l_ref[...] = (l_ref[...] * jnp.exp2(m_prev - m_new)
                  + jnp.sum(jnp.exp2(x - m_new), axis=-1, keepdims=True))
    m_ref[...] = m_new


def _softmax_norm_kernel(x_ref, m_ref, l_ref, o_ref):
    # Pass 2 of the online softmax: elementwise normalization.
    x = x_ref[...].astype(jnp.float32)
    l = l_ref[...]
    inv = pl.reciprocal(l, approx=True)
    inv = inv * (2.0 - l * inv)
    o_ref[...] = (jnp.exp2(x - m_ref[...]) * inv).astype(o_ref.dtype)


# ---------------------------------------------------------------------------
# pallas_call wrappers
# ---------------------------------------------------------------------------
def _softmax_last_axis_chunked(x2d, budget, vmem_limit, ncores):
    """Two-pass online softmax for reduction dims too large for one block."""
    rows, d = (int(s) for s in x2d.shape)
    sub = _sublane(x2d.dtype)
    cand = max(128, (budget // sub) // 128 * 128)
    tile_d = d if d <= cand else cand
    tile_rows = _pick_tile(rows, max(sub, budget // tile_d), sub, ncores)
    g_rows, g_d = _cdiv(rows, tile_rows), _cdiv(d, tile_d)

    stats = functools.partial(_softmax_stats_kernel, d=d, tile_d=tile_d)
    m, l = pl.pallas_call(
        stats,
        out_shape=(jax.ShapeDtypeStruct((rows, 1), jnp.float32),
                   jax.ShapeDtypeStruct((rows, 1), jnp.float32)),
        grid_spec=pltpu.PrefetchScalarGridSpec(
            num_scalar_prefetch=0,
            grid=(g_rows, g_d),
            in_specs=[pl.BlockSpec((tile_rows, tile_d), lambda i, k: (i, k))],
            out_specs=(pl.BlockSpec((tile_rows, 1), lambda i, k: (i, 0)),
                       pl.BlockSpec((tile_rows, 1), lambda i, k: (i, 0))),
        ),
        compiler_params=pltpu.CompilerParams(
            dimension_semantics=("parallel", "arbitrary"),
            vmem_limit_bytes=vmem_limit),
    )(x2d)

    return pl.pallas_call(
        _softmax_norm_kernel,
        out_shape=jax.ShapeDtypeStruct((rows, d), x2d.dtype),
        grid_spec=pltpu.PrefetchScalarGridSpec(
            num_scalar_prefetch=0,
            grid=(g_rows, g_d),
            in_specs=[pl.BlockSpec((tile_rows, tile_d), lambda i, k: (i, k)),
                      pl.BlockSpec((tile_rows, 1), lambda i, k: (i, 0)),
                      pl.BlockSpec((tile_rows, 1), lambda i, k: (i, 0))],
            out_specs=pl.BlockSpec((tile_rows, tile_d), lambda i, k: (i, k)),
        ),
        compiler_params=pltpu.CompilerParams(
            dimension_semantics=("parallel", "parallel"),
            vmem_limit_bytes=vmem_limit),
    )(x2d, m, l)


def _softmax_last_axis(x2d, budget, vmem_limit, ncores):
    rows, d = (int(s) for s in x2d.shape)
    sub = _sublane(x2d.dtype)

    # Lane packing for small d: lane-dense stores are the biggest measured
    # lever (masked -> unmasked stores).  Pure reshape, no transpose.
    if 8 <= d < 128 and 128 % d == 0 and rows % (128 // d) == 0:
        pack = 128 // d
        rows2 = rows // pack
        tile_rows = _pick_tile(rows2, max(sub, budget // 128), sub, ncores)
        kern = functools.partial(_softmax_packed_lane_kernel, d=d, pack=pack)
        y = pl.pallas_call(
            kern,
            out_shape=jax.ShapeDtypeStruct((rows2, 128), x2d.dtype),
            grid_spec=pltpu.PrefetchScalarGridSpec(
                num_scalar_prefetch=0,
                grid=(_cdiv(rows2, tile_rows),),
                in_specs=[pl.BlockSpec((tile_rows, 128), lambda i: (i, 0))],
                out_specs=pl.BlockSpec((tile_rows, 128), lambda i: (i, 0)),
            ),
            compiler_params=pltpu.CompilerParams(
                dimension_semantics=("parallel",),
                vmem_limit_bytes=vmem_limit),
        )(x2d.reshape(rows2, 128))
        return y.reshape(rows, d)
    # TODO(synk): d < 8, or d < 128 with 128 % d != 0, or rows % pack != 0 still
    # uses the plain path below and pays masked vst.msk partial stores
    # (documented efficiency cliff; full segmented-pad handling not implemented).

    if budget // max(d, 1) >= sub:
        # Whole reduction axis fits in one block: single-pass kernel.
        tile_rows = _pick_tile(rows, max(sub, budget // max(d, 1)), sub, ncores)
        return pl.pallas_call(
            _softmax_lane_kernel,
            out_shape=jax.ShapeDtypeStruct((rows, d), x2d.dtype),
            grid_spec=pltpu.PrefetchScalarGridSpec(
                num_scalar_prefetch=0,
                grid=(_cdiv(rows, tile_rows),),
                in_specs=[pl.BlockSpec((tile_rows, d), lambda i: (i, 0))],
                out_specs=pl.BlockSpec((tile_rows, d), lambda i: (i, 0)),
            ),
            compiler_params=pltpu.CompilerParams(
                dimension_semantics=("parallel",),
                vmem_limit_bytes=vmem_limit),
        )(x2d)

    # Reduction axis too large for one VMEM block (vocab-sized softmax; hits
    # first on v7x's 64 MiB/TC): two-pass online softmax over d-chunks.
    return _softmax_last_axis_chunked(x2d, budget, vmem_limit, ncores)


def _softmax_middle_axis(x3d, budget, vmem_limit, ncores):
    pre, d, post = (int(s) for s in x3d.shape)
    # Widen the lane (post) tile first: contiguous DMA runs are only
    # tile_post*itemsize bytes for a (tile_pre, d, tile_post) block of a
    # row-major array, so long lanes >> 512 B matter more than tile_pre.
    if d * post <= budget or post <= 128:
        tile_post = post
    else:
        tile_post = max(128, min((post // 128) * 128,
                                 (budget // d) // 128 * 128))
    tile_pre = _pick_tile(pre, max(1, budget // max(d * tile_post, 1)), 1, ncores)
    g_pre, g_post = _cdiv(pre, tile_pre), _cdiv(post, tile_post)
    if ncores >= 2 and g_pre * g_post < 2 and post > 256:
        # Give both v7x TensorCores a block by splitting the post axis.
        cand = max(128, _round_up(_cdiv(post, 2), 128))
        if cand < post:
            tile_post = cand
            g_post = _cdiv(post, tile_post)
    return pl.pallas_call(
        _softmax_sublane_kernel,
        out_shape=jax.ShapeDtypeStruct((pre, d, post), x3d.dtype),
        grid_spec=pltpu.PrefetchScalarGridSpec(
            num_scalar_prefetch=0,
            grid=(g_pre, g_post),
            in_specs=[pl.BlockSpec((tile_pre, d, tile_post),
                                   lambda i, j: (i, 0, j))],
            out_specs=pl.BlockSpec((tile_pre, d, tile_post),
                                   lambda i, j: (i, 0, j)),
        ),
        compiler_params=pltpu.CompilerParams(
            dimension_semantics=("parallel", "parallel"),
            vmem_limit_bytes=vmem_limit),
    )(x3d)


@functools.partial(jax.jit, static_argnames=("dim", "_max_block_elems"))
def softmax_exp2(x, dim=-1, _max_block_elems=None):
    """Equivalent to SoftmaxExp2Base(dim).forward(x).

    `_max_block_elems` is a testing hook that overrides the VMEM-derived block
    budget (used to exercise the online-softmax fallback at small shapes).
    """
    ndim = x.ndim
    axis = dim % ndim
    shape = x.shape
    d = int(shape[axis])
    itemsize = jnp.dtype(x.dtype).itemsize
    ncores = _num_tensorcores()
    vmem_limit = _vmem_limit_bytes()
    budget = (int(_max_block_elems) if _max_block_elems
              else _budget_elems(x.dtype, x.dtype, vmem_limit))

    if axis == ndim - 1:
        rows = math.prod(shape[:-1])
        y = _softmax_last_axis(x.reshape(rows, d), budget, vmem_limit, ncores)
        return y.reshape(shape)

    pre = math.prod(shape[:axis])
    post = math.prod(shape[axis + 1:])
    lane_sparse_post = post * itemsize < 512        # masked stores, tiny DMA runs
    too_big_for_sublane = d * min(post, 128) > budget
    if lane_sparse_post or too_big_for_sublane:
        # One extra HBM transpose round-trip beats masked partial stores, and
        # gives access to the online-softmax fallback for huge d.
        xt = jnp.moveaxis(x, axis, ndim - 1)
        y = _softmax_last_axis(xt.reshape(math.prod(xt.shape[:-1]), d),
                               budget, vmem_limit, ncores)
        return jnp.moveaxis(y.reshape(xt.shape), ndim - 1, axis)

    # Pure reshape (no transpose); reduction runs along the sublane axis.
    y = _softmax_middle_axis(x.reshape(pre, d, post), budget, vmem_limit, ncores)
    return y.reshape(shape)


# ---------------------------------------------------------------------------
# Self-test
# ---------------------------------------------------------------------------
if __name__ == "__main__":
    key = jax.random.PRNGKey(0)

    def ref_softmax(v, dim):
        m = jnp.max(v, axis=dim, keepdims=True)
        e = jnp.exp((v - m) * LN2)
        return e / jnp.sum(e, axis=dim, keepdims=True)

    def check(x, dim, **kw):
        y = jax.block_until_ready(softmax_exp2(x, dim=dim, **kw))
        assert y.shape == x.shape and y.dtype == x.dtype
        r = ref_softmax(x.astype(jnp.float32), dim).astype(x.dtype)
        assert jnp.allclose(y, r, atol=2e-5, rtol=2e-5), (x.shape, dim)

    k1, k2, k3, k4 = jax.random.split(key, 4)

    # NCHW-style input, softmax over channels -> sublane-reduction path.
    x = jax.random.normal(k1, (2, 4, 16, 32), dtype=jnp.float32)
    check(x, 1)

    # Last-dim softmax with small D=32 -> lane-packed path (dense 128-lane stores).
    check(x, -1)

    # Last-dim softmax, D=160 (not a divisor of 128) -> plain lane path.
    x2 = jax.random.normal(k2, (4, 3, 160), dtype=jnp.float32)
    check(x2, -1)

    # Tiny trailing dim (post=8) -> transpose + last-axis fallback.
    x3 = jax.random.normal(k3, (2, 6, 8), dtype=jnp.float32)
    check(x3, 1)

    # Online (chunked) two-pass path, forced small block budget to emulate a
    # vocab-sized reduction dim overflowing v7x's VMEM, at small test shapes.
    x4 = jax.random.normal(k4, (16, 160), dtype=jnp.float32)
    check(x4, -1, _max_block_elems=1024)

    print("KERNEL_OK")
</pallas_src>

<mosaic_0001>
module attributes {stable_mosaic.version = 11 : i64} {
  func.func @_softmax_sublane_kernel(%arg0: i32, %arg1: i32, %arg2: memref<2x4x512xf32, #tpu.memory_space<vmem>>, %arg3: memref<2x4x512xf32, #tpu.memory_space<vmem>>) attributes {dimension_semantics = [#tpu.dimension_semantics<parallel>, #tpu.dimension_semantics<parallel>], iteration_bounds = array<i64: 1, 1>, scalar_prefetch = 0 : i64, scratch_operands = 0 : i64, tpu.core_type = #tpu.core_type<tc>, window_params = [{transform_indices = @transform_0, window_bounds = array<i64: 2, 4, 512>}, {transform_indices = @transform_1, window_bounds = array<i64: 2, 4, 512>}]} {
    %c0 = arith.constant 0 : index
    %c0_0 = arith.constant 0 : index
    %c0_1 = arith.constant 0 : index
    %0 = vector.load %arg2[%c0, %c0_0, %c0_1] : memref<2x4x512xf32, #tpu.memory_space<vmem>>, vector<2x4x512xf32>
    %cst = arith.constant dense<0xFF800000> : vector<2x512xf32>
    %1 = vector.multi_reduction <maximumf>, %0, %cst [1] : vector<2x4x512xf32> to vector<2x512xf32>
    %2 = vector.shape_cast %1 : vector<2x512xf32> to vector<2x1x512xf32>
    %3 = vector.broadcast %2 : vector<2x1x512xf32> to vector<2x4x512xf32>
    %4 = arith.subf %0, %3 : vector<2x4x512xf32>
    %5 = math.exp2 %4 : vector<2x4x512xf32>
    %cst_2 = arith.constant dense<0.000000e+00> : vector<2x512xf32>
    %6 = vector.multi_reduction <add>, %5, %cst_2 [1] : vector<2x4x512xf32> to vector<2x512xf32>
    %7 = vector.shape_cast %6 : vector<2x512xf32> to vector<2x1x512xf32>
    %8 = tpu.reciprocal %7 {approx = true} : vector<2x1x512xf32> -> vector<2x1x512xf32>
    %9 = arith.mulf %7, %8 : vector<2x1x512xf32>
    %cst_3 = arith.constant 2.000000e+00 : f32
    %10 = vector.broadcast %cst_3 : f32 to vector<2x1x512xf32>
    %11 = arith.subf %10, %9 : vector<2x1x512xf32>
    %12 = arith.mulf %8, %11 : vector<2x1x512xf32>
    %13 = vector.broadcast %12 : vector<2x1x512xf32> to vector<2x4x512xf32>
    %14 = arith.mulf %5, %13 : vector<2x4x512xf32>
    %c0_4 = arith.constant 0 : index
    %c0_5 = arith.constant 0 : index
    %c0_6 = arith.constant 0 : index
    %15 = vector.load %arg3[%c0_4, %c0_5, %c0_6] : memref<2x4x512xf32, #tpu.memory_space<vmem>>, vector<2x4x512xf32>
    tpu.vector_store %arg3[%c0_4, %c0_5, %c0_6], %14 {strides = array<i32>} : memref<2x4x512xf32, #tpu.memory_space<vmem>>, vector<2x4x512xf32>,
    return
  }
  func.func @transform_0(%arg0: i32, %arg1: i32) -> (i32, i32, i32) {
    %c0_i32 = arith.constant 0 : i32
    %c0_i32_0 = arith.constant 0 : i32
    return %arg0, %c0_i32, %arg1 : i32, i32, i32
  }
  func.func @transform_1(%arg0: i32, %arg1: i32) -> (i32, i32, i32) {
    %c0_i32 = arith.constant 0 : i32
    %c0_i32_0 = arith.constant 0 : i32
    return %arg0, %c0_i32, %arg1 : i32, i32, i32
  }
}

</mosaic_0001>

<bundles_post_ra>
// kernel: softmax_exp2.1
= control target key start
LH: loop header
LB: loop body
LE: loop exit
PB: predicated region body
PF: predicated region fallthrough
CT: control target
= control target key end

     0   :  { %6 = vsyncpa [#allocation3], 0  ;;  %s449_s0 = inlined_call_operand.hbm [shape: f32[2,4,512], index: 0, kind: input, shape index: {}]   ;;  %s450_s1 = inlined_call_operand.hbm [shape: f32[2,4,512], index: 1, kind: output, shape index: {}]  }
   0x1   :  { %7 = vsyncpa [#allocation4], 0  ;;  %s341_s6 = smov [#allocation2]   ;;  %s293_s10 = scalar_lea.hbm %s449_s0, 512 }
   0x2   :  { %s13_s7 = sshll.u32 %s341_s6, 4  ;;  %p294_p0 = scmp.ne.s32.totalorder %s449_s0, %s293_s10  ;;  %s14_s7 = int_to_ptr.vmem [resolvable:$true] %s13_s7 }
   0x3   :  { %p297_p1 = scmp.lt.u32.totalorder %s293_s10, %s449_s0 }
   0x5   :  { %p299_p2 = pnand %p297_p1, %p294_p0 }
   0x7   :  { %302 = shalt.err (!%p299_p2)
}
   0x8   :  { %s303_s15 = scalar_lea.vmem %s14_s7, 512  ;;  %p308_p4 = scmp.lt.s32.totalorder %s14_s7, %s14_s7 }
   0x9   :  { %p304_p3 = scmp.ne.s32.totalorder %s14_s7, %s303_s15  ;;  %p309_p5 = scmp.lt.s32.totalorder %s303_s15, %s303_s15 }
   0xb   :  { %p310_p6 = por %p309_p5, %p308_p4 }
   0xd   :  { %p311_p7 = pnand %p310_p6, %p304_p3 }
   0xf   :  { %314 = shalt.err (!%p311_p7)
}
  0x10   :  { %s342_s16 = smov 256   ;;  %s343_s17 = smov 16  }
  0x11   :  { %19 = dma.hbm_to_vmem [thread:$0]  %s449_s0, 512, %s14_s7, [#allocation3], %s342_s16, %s342_s16, %s343_s17  }
  0x12   :  { %337 = dma.done.wait [#allocation3], 512  }
  0x13   :  { %338 = vsyncadd [#allocation3], 4294966784  ;;  %vm39_vm0 = vcmask 1043456   ;;  %v370_v0 = vld [vmem:[#allocation2] sm:$0xff]  ;;  %v372_v1 = vld [vmem:[#allocation2 + $0x8] sm:$0xff]  ;;  %s344_s0 = smov [#allocation5]  }
  0x14   :  { %v374_v2 = vld [vmem:[#allocation2 + $0x10] sm:$0xff]  ;;  %v31_v3 = vcombine.high %v370_v0, %v370_v0  ;;  %v40_v4 = vsel %vm39_vm0, %v370_v0, -inf  ;;  %v32_v5 = vcombine.high %v372_v1, %v372_v1  ;;  %v54_v6 = vsel %vm39_vm0, %v372_v1, -inf  ;;  %v384_v7 = vld [vmem:[#allocation2 + $0x18] sm:$0xff]  ;;  %s249_s20 = sshll.u32 %s344_s0, 4  ;;  %s250_s20 = int_to_ptr.vmem [resolvable:$true] %s249_s20 }
  0x15   :  { %v41_v8 = vrot.slane %v40_v4, 4  ;;  %v55_v9 = vrot.slane %v54_v6, 4  ;;  %v33_v10 = vcombine.high %v374_v2, %v374_v2  ;;  %v68_v11 = vsel %vm39_vm0, %v374_v2, -inf  ;;  %s315_s21 = scalar_lea.vmem %s250_s20, 512  ;;  %p320_p9 = scmp.lt.s32.totalorder %s250_s20, %s250_s20 }
  0x16   :  { %v47_v12 = vsel %vm39_vm0, %v31_v3, -inf  ;;  %v61_v13 = vsel %vm39_vm0, %v32_v5, -inf  ;;  %v69_v14 = vrot.slane %v68_v11, 4  ;;  %v34_v15 = vcombine.high %v384_v7, %v384_v7  ;;  %p316_p8 = scmp.ne.s32.totalorder %s250_s20, %s315_s21  ;;  %p321_p10 = scmp.lt.s32.totalorder %s315_s21, %s315_s21 }
  0x17   :  { %v42_v16 = vmax.f32 %v40_v4, %v41_v8  ;;  %v48_v17 = vrot.slane %v47_v12, 4  ;;  %v56_v18 = vmax.f32 %v54_v6, %v55_v9  ;;  %v62_v19 = vrot.slane %v61_v13, 4 }
  0x18   :  { %v70_v20 = vmax.f32 %v68_v11, %v69_v14  ;;  %v75_v21 = vsel %vm39_vm0, %v33_v10, -inf  ;;  %v82_v22 = vsel %vm39_vm0, %v384_v7, -inf  ;;  %v89_v23 = vsel %vm39_vm0, %v34_v15, -inf  ;;  %p322_p11 = por %p321_p10, %p320_p9 }
  0x19   :  { %v43_v24 = vrot.slane %v42_v16, 2  ;;  %v49_v25 = vmax.f32 %v47_v12, %v48_v17  ;;  %v57_v26 = vrot.slane %v56_v18, 2  ;;  %v63_v27 = vmax.f32 %v61_v13, %v62_v19 }
  0x1a   :  { %v71_v28 = vrot.slane %v70_v20, 2  ;;  %v76_v29 = vrot.slane %v75_v21, 4  ;;  %v83_v30 = vrot.slane %v82_v22, 4  ;;  %v90_v31 = vrot.slane %v89_v23, 4  ;;  %p323_p12 = pnand %p322_p11, %p316_p8 }
  0x1b   :  { %v44_v32 = vmax.f32 %v42_v16, %v43_v24  ;;  %v50_v33 = vrot.slane %v49_v25, 2  ;;  %v58_v34 = vmax.f32 %v56_v18, %v57_v26  ;;  %v64_v35 = vrot.slane %v63_v27, 2 }
  0x1c   :  { %v72_v36 = vmax.f32 %v70_v20, %v71_v28  ;;  %v77_v37 = vmax.f32 %v75_v21, %v76_v29  ;;  %v84_v38 = vmax.f32 %v82_v22, %v83_v30  ;;  %v91_v39 = vmax.f32 %v89_v23, %v90_v31 }
  0x1d   :  { %v45_v40 = vrot.slane %v44_v32, 1  ;;  %v51_v41 = vmax.f32 %v49_v25, %v50_v33  ;;  %v59_v42 = vrot.slane %v58_v34, 1  ;;  %v65_v43 = vmax.f32 %v63_v27, %v64_v35 }
  0x1e   :  { %v73_v44 = vrot.slane %v72_v36, 1  ;;  %v78_v45 = vrot.slane %v77_v37, 2  ;;  %v85_v46 = vrot.slane %v84_v38, 2  ;;  %v92_v47 = vrot.slane %v91_v39, 2 }
  0x1f   :  { %v46_v48 = vmax.f32 %v44_v32, %v45_v40  ;;  %v52_v49 = vrot.slane %v51_v41, 1  ;;  %v60_v50 = vmax.f32 %v58_v34, %v59_v42  ;;  %v66_v51 = vrot.slane %v65_v43, 1 }
  0x20   :  { %v79_v52 = vmax.f32 %v77_v37, %v78_v45  ;;  %v86_v53 = vmax.f32 %v84_v38, %v85_v46  ;;  %v93_v54 = vmax.f32 %v91_v39, %v92_v47  ;;  %v74_v57 = vmax.f32 %v72_v36, %v73_v44 }
  0x21   :  { %v53_v55 = vmax.f32 %v51_v41, %v52_v49  ;;  %v67_v56 = vmax.f32 %v65_v43, %v66_v51 }
  0x22   :  { %v80_v58 = vrot.slane %v79_v52, 1  ;;  %v87_v59 = vrot.slane %v86_v53, 1  ;;  %v94_v60 = vrot.slane %v93_v54, 1 }
  0x23   :  { %v104_v61 = vcombine.low %v46_v48, %v53_v55  ;;  %v105_v62 = vcombine.low %v60_v50, %v67_v56 }
  0x24   :  { %v81_v63 = vmax.f32 %v79_v52, %v80_v58  ;;  %v88_v3 = vmax.f32 %v86_v53, %v87_v59  ;;  %v95_v4 = vmax.f32 %v93_v54, %v94_v60 }
  0x25   :  { %v112_v5 = vsub.f32 %v370_v0, %v104_v61  ;;  %v113_v6 = vsub.f32 %v372_v1, %v105_v62 }
  0x26   :  { %v106_v8 = vcombine.low %v74_v57, %v81_v63  ;;  %v107_v9 = vcombine.low %v88_v3, %v95_v4 }
  0x27   :  { %269 = vpow2.f32 %v112_v5 }
  0x28   :  { %271 = vpow2.f32 %v113_v6  ;;  %v114_v10 = vsub.f32 %v374_v2, %v106_v8  ;;  %v115_v11 = vsub.f32 %v384_v7, %v107_v9 }
  0x2a   :  { %273 = vpow2.f32 %v114_v10 }
  0x2b   :  { %275 = vpow2.f32 %v115_v11 }
  0x31   :  { %v402_v12 = vpop.eup %269 }
  0x32   :  { %v404_v13 = vpop.eup %271  ;;  %v124_v14 = vcombine.high %v402_v12, %v402_v12  ;;  %v132_v0 = vsel %vm39_vm0, %v402_v12, 0.0 }
  0x33   :  { %v133_v1 = vrot.slane %v132_v0, 4  ;;  %v125_v15 = vcombine.high %v404_v13, %v404_v13  ;;  %v146_v2 = vsel %vm39_vm0, %v404_v13, 0.0 }
  0x34   :  { %v414_v7 = vpop.eup %273  ;;  %v139_v16 = vsel %vm39_vm0, %v124_v14, 0.0  ;;  %v147_v17 = vrot.slane %v146_v2, 4 }
  0x35   :  { %v417_v18 = vpop.eup %275  ;;  %v134_v19 = vadd.f32 %v133_v1, %v132_v0  ;;  %v140_v20 = vrot.slane %v139_v16, 4  ;;  %v153_v21 = vsel %vm39_vm0, %v125_v15, 0.0  ;;  %v126_v22 = vcombine.high %v414_v7, %v414_v7 }
  0x36   :  { %v148_v23 = vadd.f32 %v147_v17, %v146_v2  ;;  %v154_v24 = vrot.slane %v153_v21, 4  ;;  %v160_v25 = vsel %vm39_vm0, %v414_v7, 0.0  ;;  %v127_v26 = vcombine.high %v417_v18, %v417_v18 }
  0x37   :  { %v135_v27 = vrot.slane %v134_v19, 2  ;;  %v141_v28 = vadd.f32 %v140_v20, %v139_v16  ;;  %v161_v29 = vrot.slane %v160_v25, 4  ;;  %v167_v30 = vsel %vm39_vm0, %v126_v22, 0.0 }
  0x38   :  { %v149_v31 = vrot.slane %v148_v23, 2  ;;  %v155_v32 = vadd.f32 %v154_v24, %v153_v21  ;;  %v168_v33 = vrot.slane %v167_v30, 4  ;;  %v174_v34 = vsel %vm39_vm0, %v417_v18, 0.0 }
  0x39   :  { %v136_v35 = vadd.f32 %v135_v27, %v134_v19  ;;  %v142_v36 = vrot.slane %v141_v28, 2  ;;  %v162_v37 = vadd.f32 %v161_v29, %v160_v25  ;;  %v175_v38 = vrot.slane %v174_v34, 4 }
  0x3a   :  { %v150_v39 = vadd.f32 %v149_v31, %v148_v23  ;;  %v156_v40 = vrot.slane %v155_v32, 2  ;;  %v169_v41 = vadd.f32 %v168_v33, %v167_v30  ;;  %v181_v42 = vsel %vm39_vm0, %v127_v26, 0.0 }
  0x3b   :  { %v137_v43 = vrot.slane %v136_v35, 1  ;;  %v143_v44 = vadd.f32 %v142_v36, %v141_v28  ;;  %v163_v45 = vrot.slane %v162_v37, 2  ;;  %v176_v46 = vadd.f32 %v175_v38, %v174_v34 }
  0x3c   :  { %v151_v47 = vrot.slane %v150_v39, 1  ;;  %v157_v48 = vadd.f32 %v156_v40, %v155_v32  ;;  %v170_v49 = vrot.slane %v169_v41, 2  ;;  %v182_v50 = vrot.slane %v181_v42, 4 }
  0x3d   :  { %v138_v51 = vadd.f32 %v137_v43, %v136_v35  ;;  %v144_v52 = vrot.slane %v143_v44, 1  ;;  %v164_v53 = vadd.f32 %v163_v45, %v162_v37  ;;  %v177_v54 = vrot.slane %v176_v46, 2 }
  0x3e   :  { %v152_v55 = vadd.f32 %v151_v47, %v150_v39  ;;  %v158_v56 = vrot.slane %v157_v48, 1  ;;  %v171_v57 = vadd.f32 %v170_v49, %v169_v41  ;;  %v183_v58 = vadd.f32 %v182_v50, %v181_v42 }
  0x3f   :  { %v145_v59 = vadd.f32 %v144_v52, %v143_v44  ;;  %277 = vrcp.f32 %v138_v51  ;;  %v165_v60 = vrot.slane %v164_v53, 1  ;;  %v178_v61 = vadd.f32 %v177_v54, %v176_v46 }
  0x40   :  { %v159_v62 = vadd.f32 %v158_v56, %v157_v48  ;;  %279 = vrcp.f32 %v152_v55  ;;  %v172_v63 = vrot.slane %v171_v57, 1  ;;  %v184_v3 = vrot.slane %v183_v58, 2 }
  0x41   :  { %281 = vrcp.f32 %v145_v59  ;;  %v166_v4 = vadd.f32 %v165_v60, %v164_v53  ;;  %v179_v5 = vrot.slane %v178_v61, 1 }
  0x42   :  { %283 = vrcp.f32 %v159_v62  ;;  %v173_v6 = vadd.f32 %v172_v63, %v171_v57  ;;  %v185_v8 = vadd.f32 %v184_v3, %v183_v58 }
  0x43   :  { %285 = vrcp.f32 %v166_v4  ;;  %v180_v9 = vadd.f32 %v179_v5, %v178_v61 }
  0x44   :  { %287 = vrcp.f32 %v173_v6  ;;  %v186_v10 = vrot.slane %v185_v8, 1 }
  0x45   :  { %289 = vrcp.f32 %v180_v9 }
  0x46   :  { %v187_v11 = vadd.f32 %v186_v10, %v185_v8 }
  0x48   :  { %291 = vrcp.f32 %v187_v11 }
  0x49   :  { %v278_v14 = vpop.eup %277 }
  0x4a   :  { %v280_v0 = vpop.eup %279  ;;  %v196_v1 = vmul.f32 %v278_v14, %v138_v51 }
  0x4b   :  { %v282_v15 = vpop.eup %281  ;;  %v198_v2 = vmul.f32 %v280_v0, %v152_v55 }
  0x4c   :  { %v284_v16 = vpop.eup %283  ;;  %v197_v17 = vmul.f32 %v282_v15, %v145_v59  ;;  %v204_v19 = vsub.f32 2.0, %v196_v1 }
  0x4d   :  { %v286_v20 = vpop.eup %285  ;;  %v199_v21 = vmul.f32 %v284_v16, %v159_v62  ;;  %v206_v22 = vsub.f32 2.0, %v198_v2 }
  0x4e   :  { %v288_v23 = vpop.eup %287  ;;  %v205_v24 = vsub.f32 2.0, %v197_v17  ;;  %v212_v25 = vmul.f32 %v278_v14, %v204_v19  ;;  %v200_v26 = vmul.f32 %v286_v20, %v166_v4 }
  0x4f   :  { %v290_v27 = vpop.eup %289  ;;  %v207_v28 = vsub.f32 2.0, %v199_v21  ;;  %v214_v29 = vmul.f32 %v280_v0, %v206_v22  ;;  %v201_v30 = vmul.f32 %v288_v23, %v173_v6 }
  0x50   :  { %v213_v31 = vmul.f32 %v282_v15, %v205_v24  ;;  %v208_v32 = vsub.f32 2.0, %v200_v26  ;;  %v202_v33 = vmul.f32 %v290_v27, %v180_v9 }
  0x51   :  { %v215_v34 = vmul.f32 %v284_v16, %v207_v28  ;;  %v209_v35 = vsub.f32 2.0, %v201_v30 }
  0x52   :  { %v292_v36 = vpop.eup %291  ;;  %v228_v37 = vcombine.low %v212_v25, %v213_v31  ;;  %v216_v38 = vmul.f32 %v286_v20, %v208_v32  ;;  %v210_v39 = vsub.f32 2.0, %v202_v33 }
  0x53   :  { %v229_v40 = vcombine.low %v214_v29, %v215_v34  ;;  %v217_v41 = vmul.f32 %v288_v23, %v209_v35  ;;  %v203_v42 = vmul.f32 %v292_v36, %v187_v11 }
  0x54   :  { %v236_v43 = vmul.f32 %v402_v12, %v228_v37  ;;  %v218_v47 = vmul.f32 %v290_v27, %v210_v39 }
  0x55   :  { %v237_v44 = vmul.f32 %v404_v13, %v229_v40  ;;  %v230_v45 = vcombine.low %v216_v38, %v217_v41  ;;  %v211_v46 = vsub.f32 2.0, %v203_v42 }
  0x56   :  { %240 = vst [vmem:[#allocation5] sm:$0xff] %v236_v43 }
  0x57   :  { %241 = vst [vmem:[#allocation5 + $0x8] sm:$0xff] %v237_v44  ;;  %v238_v48 = vmul.f32 %v414_v7, %v230_v45  ;;  %v219_v49 = vmul.f32 %v292_v36, %v211_v46 }
  0x59   :  { %242 = vst [vmem:[#allocation5 + $0x10] sm:$0xff] %v238_v48  ;;  %v231_v50 = vcombine.low %v218_v47, %v219_v49 }
  0x5b   :  { %v239_v51 = vmul.f32 %v417_v18, %v231_v50 }
  0x5d   :  { %243 = vst [vmem:[#allocation5 + $0x18] sm:$0xff] %v239_v51 }
  0x5e   :  { %326 = shalt.err (!%p323_p12)
}
  0x5f   :  { %s327_s24 = scalar_lea.hbm %s450_s1, 512 }
  0x60   :  { %p328_p13 = scmp.ne.s32.totalorder %s450_s1, %s327_s24  ;;  %p331_p0 = scmp.lt.u32.totalorder %s327_s24, %s450_s1 }
  0x62   :  { %p333_p1 = pnand %p331_p0, %p328_p13 }
  0x64   :  { %336 = shalt.err (!%p333_p1)
}
  0x65   :  { %255 = dma.vmem_to_hbm [thread:$0]  %s250_s20, 512, %s450_s1, [#allocation4], %s342_s16, %s342_s16, %s343_s17  }
  0x66   :  { %339 = dma.done.wait [#allocation4], 512  }
  0x67   :  { %340 = vsyncadd [#allocation4], 4294966784 }
  0x68   :  { %259 = vsyncpa [#allocation3], 1 }
  0x69   :  { %260 = vsyncpa [#allocation4], 1 }

</bundles_post_ra>
